<compile_context>
chip_gen: v7x
topology: tpu7x:2x2x1
jax: 0.10.0
libtpu: 0.0.40
codegen_flags: <defaults>
</compile_context>

<pallas_src>
import functools

import jax
import jax.numpy as jnp
from jax.experimental import pallas as pl
from jax.experimental.pallas import tpu as pltpu


# ----------------------------------------------------------------------------
# Fused MoE-MLP kernel (shared + routed experts in one pass).
# ----------------------------------------------------------------------------
def _moe_mlp_kernel(ids_ref, nact_ref, x_ref, rw_ref, wgu_ref, wd_ref,
                    o_ref, acc_ref, *, tI):
    # grid = (token_tiles, experts, k_tiles); expert/k axes accumulate into acc.
    del ids_ref  # only used by the index_maps
    e = pl.program_id(1)
    k = pl.program_id(2)

    @pl.when(jnp.logical_and(e == 0, k == 0))
    def _init():
        acc_ref[...] = jnp.zeros_like(acc_ref)

    # Skip compute for padded (inactive) expert slots.
    @pl.when(e < nact_ref[0])
    def _compute():
        x = x_ref[...]                                    # (tT, H)   bf16
        wgu = wgu_ref[0, 0]                               # (H, 2*tI) bf16 [gate|up]
        wd = wd_ref[0]                                    # (tI, H)   bf16
        gu = jnp.dot(x, wgu, preferred_element_type=jnp.float32)   # (tT, 2*tI) f32
        g = gu[:, :tI]                                    # lane-aligned static split
        u = gu[:, tI:]
        # SiLU via EUP exp + approx reciprocal (keeps the divide off the VPU).
        silu_g = g * pl.reciprocal(1.0 + jnp.exp(-g), approx=True)
        w = rw_ref[0].astype(jnp.float32)                 # (tT, 1) routing weight
        # Apply routing weight to the (tT, tI) activation (cheaper than (tT, H)).
        act = (silu_g * u * w).astype(wd.dtype)
        acc_ref[...] += jnp.dot(act, wd, preferred_element_type=jnp.float32)

    @pl.when(jnp.logical_and(e == pl.num_programs(1) - 1,
                             k == pl.num_programs(2) - 1))
    def _finalize():
        o_ref[...] = acc_ref[...].astype(o_ref.dtype)


def _pick_tile(dim, target, mult):
    """Largest divisor of `dim` that is <= target and a multiple of `mult`,
    else the full dim (full-dim blocks are always legal)."""
    if dim <= target:
        return dim
    cand = (target // mult) * mult
    while cand >= mult:
        if dim % cand == 0:
            return cand
        cand -= mult
    return dim


def _moe_mlp_fused(x, rw_slab, ids, n_active, wg, wu, wd, *, out_dtype):
    """out[t] = sum_{e active} rw[e, t] * MLP_e(x[t]) (shared + scaled routed)."""
    T, H = x.shape
    E_tot, _, I = wg.shape
    e_grid = ids.shape[0]

    # Generation-aware VMEM budget / tile targets.
    try:
        vmem_cap = int(pltpu.get_tpu_info().vmem_capacity_bytes)
    except Exception:  # pragma: no cover - conservative fallback
        vmem_cap = 64 * 1024 * 1024
    vmem_limit = min(vmem_cap * 3 // 4, 100 * 1024 * 1024)
    tI_target = 512 if vmem_cap >= (96 << 20) else 256

    tT = _pick_tile(T, 512, 16)       # bf16 sublane packing -> multiple of 16 (or full)
    tI = _pick_tile(I, tI_target, 128)  # lane dim of weight tiles -> multiple of 128 (or full)
    nt, nk = T // tT, I // tI

    # Pre-block gate/up into one slab: (E_tot, nk, H, 2*tI), gate cols then up cols
    # per k-block (one-time weight layout; lane-dense, one DMA stream per step).
    wg_b = wg.reshape(E_tot, H, nk, tI)
    wu_b = wu.reshape(E_tot, H, nk, tI)
    wgu = jnp.transpose(jnp.concatenate([wg_b, wu_b], axis=-1), (0, 2, 1, 3))

    def _eid(e, ids_ref, n_ref):
        n = n_ref[0]
        act = e < n
        safe = jnp.where(act, e, jnp.maximum(n - 1, 0))   # clamp: never index -1
        return ids_ref[safe], act

    def x_map(t, e, k, ids_ref, n_ref):
        return (t, 0)

    def o_map(t, e, k, ids_ref, n_ref):
        return (t, 0)

    def rw_map(t, e, k, ids_ref, n_ref):
        eid, _ = _eid(e, ids_ref, n_ref)
        return (eid, t, 0)

    # NOTE: inactive steps must repeat the block index of the immediately
    # preceding step (last active expert, k = nk-1) so their weight DMA is
    # elided.  This relies on the (t, e, k) grid order -- keep in sync.
    def wgu_map(t, e, k, ids_ref, n_ref):
        eid, act = _eid(e, ids_ref, n_ref)
        return (eid, jnp.where(act, k, nk - 1), 0, 0)

    def wd_map(t, e, k, ids_ref, n_ref):
        eid, act = _eid(e, ids_ref, n_ref)
        return (eid, jnp.where(act, k, nk - 1), 0)

    cost = pl.CostEstimate(
        flops=int(6 * T * e_grid * H * I),
        transcendentals=int(2 * T * e_grid * I),
        bytes_accessed=int(nt * e_grid * 6 * H * I + 4 * T * H),
    )

    kernel = functools.partial(_moe_mlp_kernel, tI=tI)
    return pl.pallas_call(
        kernel,
        out_shape=jax.ShapeDtypeStruct((T, H), out_dtype),
        grid_spec=pltpu.PrefetchScalarGridSpec(
            num_scalar_prefetch=2,
            grid=(nt, e_grid, nk),
            in_specs=[
                pl.BlockSpec((tT, H), x_map),
                pl.BlockSpec((1, tT, 1), rw_map),
                pl.BlockSpec((1, 1, H, 2 * tI), wgu_map),   # merged gate_up slab
                pl.BlockSpec((1, tI, H), wd_map),           # down proj slab
            ],
            out_specs=pl.BlockSpec((tT, H), o_map),
            scratch_shapes=[pltpu.VMEM((tT, H), jnp.float32)],
        ),
        compiler_params=pltpu.CompilerParams(
            dimension_semantics=("parallel", "arbitrary", "arbitrary"),
            vmem_limit_bytes=vmem_limit,
        ),
        cost_estimate=cost,
    )(ids, n_active, x, rw_slab, wgu, wd)


# ----------------------------------------------------------------------------
# Routing (noaux_tc grouped top-k with correction bias) -- plain JAX glue.
# ----------------------------------------------------------------------------
def grouped_topk_routing(router_logits, correction_bias, top_k, n_group,
                         topk_group, renormalize):
    T, E = router_logits.shape
    assert topk_group * (E // n_group) >= top_k, "top_k exceeds selectable experts"
    scores = jax.nn.sigmoid(router_logits)                       # (T, E)
    scores_for_choice = scores + correction_bias[None, :]        # (T, E)

    group_scores = scores_for_choice.reshape(T, n_group, E // n_group)
    k2 = min(2, E // n_group)
    top2, _ = jax.lax.top_k(group_scores, k2)
    group_metric = top2.sum(axis=-1)                             # (T, n_group)
    _, grp_idx = jax.lax.top_k(group_metric, topk_group)         # (T, topk_group)
    grp_mask = jnp.sum(jax.nn.one_hot(grp_idx, n_group, dtype=jnp.float32),
                       axis=1)                                   # (T, n_group)
    expert_mask = jnp.repeat(grp_mask, E // n_group, axis=1)     # (T, E)

    masked = jnp.where(expert_mask > 0, scores_for_choice, -jnp.inf)
    _, topk_idx = jax.lax.top_k(masked, top_k)                   # (T, top_k)
    topk_w = jnp.take_along_axis(scores, topk_idx, axis=1)       # original scores
    if renormalize:
        topk_w = topk_w / jnp.sum(topk_w, axis=1, keepdims=True)

    dense = jnp.sum(jax.nn.one_hot(topk_idx, E, dtype=jnp.float32)
                    * topk_w[..., None], axis=1)                 # (T, E)
    return dense


def compact_active_experts(dense_rw, n_shared, top_k):
    """Compacted active expert-slot ids over the concatenated
    [shared chunks | routed experts] slab, padded with the last active id,
    plus the active count.  The expert grid axis is capped at
    n_shared + min(E, T * top_k)."""
    T, E = dense_rw.shape
    e_grid = n_shared + min(E, T * top_k)
    active = jnp.any(dense_rw > 0.0, axis=0)                     # (E,)
    n_r = jnp.sum(active.astype(jnp.int32))
    order = jnp.argsort(~active).astype(jnp.int32)               # active routed first
    ids_full = jnp.concatenate(
        [jnp.arange(n_shared, dtype=jnp.int32), n_shared + order])
    n_active = (n_shared + n_r).astype(jnp.int32)
    last_active = ids_full[jnp.maximum(n_active - 1, 0)]
    pos = jnp.arange(e_grid, dtype=jnp.int32)
    ids = jnp.where(pos < n_active, ids_full[:e_grid], last_active)
    return ids, jnp.reshape(n_active, (1,)), e_grid


# ----------------------------------------------------------------------------
# Full module forward (forward_normal, tp_size == 1)
# ----------------------------------------------------------------------------
def megrez_moe_forward(params, cfg, hidden_states, pre_gate_hidden_states=None):
    T, H = hidden_states.shape
    E = cfg["n_routed_experts"]
    I = cfg["moe_intermediate_size"]
    n_shared = cfg["n_shared_experts"]
    top_k = cfg["num_experts_per_tok"]
    x = hidden_states

    # Router logits: tiny (T,H)x(H,E) matmul, lane width E << 128 -> leave to XLA.
    gate_in = (pre_gate_hidden_states
               if pre_gate_hidden_states is not None else x)
    logits = jnp.dot(gate_in.astype(jnp.float32), params["gate_w_t"],
                     preferred_element_type=jnp.float32)

    dense_rw = grouped_topk_routing(
        logits, params["e_score_correction_bias"],
        top_k=top_k, n_group=cfg["n_group"],
        topk_group=cfg["topk_group"], renormalize=cfg["norm_topk_prob"])

    # Shared expert == n_shared always-active pseudo-experts (intermediate-dim
    # chunks of the shared MegrezMoeMLP), concatenated in front of the routed ones.
    shared_wg = jnp.transpose(params["shared_wg"][0].reshape(H, n_shared, I),
                              (1, 0, 2))                          # (n_shared, H, I)
    shared_wu = jnp.transpose(params["shared_wu"][0].reshape(H, n_shared, I),
                              (1, 0, 2))
    shared_wd = params["shared_wd"][0].reshape(n_shared, I, H)
    all_wg = jnp.concatenate([shared_wg, params["expert_wg"]], axis=0)
    all_wu = jnp.concatenate([shared_wu, params["expert_wu"]], axis=0)
    all_wd = jnp.concatenate([shared_wd, params["expert_wd"]], axis=0)

    # Routing-weight slab: routed_scaling_factor folded in; shared slots = 1.
    rw_routed = (cfg["routed_scaling_factor"]
                 * jnp.transpose(dense_rw))[:, :, None]           # (E, T, 1)
    rw_shared = jnp.ones((n_shared, T, 1), jnp.float32)
    rw_slab = jnp.concatenate([rw_shared, rw_routed], axis=0)     # (E_tot, T, 1)

    ids, n_active, _ = compact_active_experts(dense_rw, n_shared, top_k)

    return _moe_mlp_fused(x, rw_slab, ids, n_active, all_wg, all_wu, all_wd,
                          out_dtype=hidden_states.dtype)


# ----------------------------------------------------------------------------
# Pure-JAX reference (for self-check; uses the same bf16-quantized weights).
# ----------------------------------------------------------------------------
def _ref_forward(params, cfg, x, pre_gate=None):
    f32 = lambda a: a.astype(jnp.float32)
    xf = f32(x)

    def mlp(h, wg, wu, wd):
        g = h @ f32(wg)
        u = h @ f32(wu)
        return (jax.nn.silu(g) * u) @ f32(wd)

    shared = mlp(xf, params["shared_wg"][0], params["shared_wu"][0],
                 params["shared_wd"][0])
    gate_in = f32(pre_gate) if pre_gate is not None else xf
    logits = gate_in @ params["gate_w_t"]
    rw = grouped_topk_routing(logits, params["e_score_correction_bias"],
                              cfg["num_experts_per_tok"], cfg["n_group"],
                              cfg["topk_group"], cfg["norm_topk_prob"])
    E = rw.shape[1]
    routed = jnp.zeros_like(xf)
    for e in range(E):
        routed = routed + rw[:, e:e + 1] * mlp(
            xf, params["expert_wg"][e], params["expert_wu"][e],
            params["expert_wd"][e])
    return routed * cfg["routed_scaling_factor"] + shared


# ----------------------------------------------------------------------------
if __name__ == "__main__":
    cfg = dict(
        hidden_size=128,
        moe_intermediate_size=128,
        n_routed_experts=8,
        n_group=4,
        topk_group=2,
        num_experts_per_tok=2,
        n_shared_experts=1,
        norm_topk_prob=True,
        routed_scaling_factor=2.5,
    )
    T = 8
    H = cfg["hidden_size"]
    I = cfg["moe_intermediate_size"]
    Ish = I * cfg["n_shared_experts"]
    E = cfg["n_routed_experts"]

    key = jax.random.PRNGKey(0)
    ks = jax.random.split(key, 10)
    s = 0.05
    bf16 = jnp.bfloat16
    params = dict(
        # MoEGate: weight stored transposed (H, E), correction bias (E,) -- f32.
        gate_w_t=jax.random.normal(ks[0], (H, E), jnp.float32) * s,
        e_score_correction_bias=jax.random.normal(ks[1], (E,), jnp.float32) * s,
        # Shared MegrezMoeMLP weights, pre-split gate/up, bf16.
        shared_wg=(jax.random.normal(ks[2], (1, H, Ish), jnp.float32) * s).astype(bf16),
        shared_wu=(jax.random.normal(ks[3], (1, H, Ish), jnp.float32) * s).astype(bf16),
        shared_wd=(jax.random.normal(ks[4], (1, Ish, H), jnp.float32) * s).astype(bf16),
        # Routed expert MegrezMoeMLP weights, pre-split gate/up, bf16.
        expert_wg=(jax.random.normal(ks[5], (E, H, I), jnp.float32) * s).astype(bf16),
        expert_wu=(jax.random.normal(ks[6], (E, H, I), jnp.float32) * s).astype(bf16),
        expert_wd=(jax.random.normal(ks[7], (E, I, H), jnp.float32) * s).astype(bf16),
    )

    hidden_states = (jax.random.normal(ks[8], (T, H), jnp.float32)).astype(bf16)
    pre_gate_hidden_states = (jax.random.normal(ks[9], (T, H), jnp.float32)).astype(bf16)

    fwd = jax.jit(functools.partial(megrez_moe_forward, params, cfg))
    out = fwd(hidden_states, pre_gate_hidden_states)
    jax.block_until_ready(out)

    ref = _ref_forward(params, cfg, hidden_states, pre_gate_hidden_states)
    assert out.shape == (T, H)
    assert jnp.allclose(out.astype(jnp.float32), ref, atol=1e-2, rtol=1e-2), \
        "mismatch vs reference"

    # TODO(synk): tensor_model_parallel_all_reduce / DeepEP dispatch paths are
    # multi-device collectives and are not modeled (tp_size == 1 path only).
    print("KERNEL_OK")
</pallas_src>

<mosaic_0001>
module attributes {stable_mosaic.version = 11 : i64} {
  func.func @_moe_mlp_kernel(%arg0: i32, %arg1: i32, %arg2: i32, %arg3: memref<9xi32, #tpu.memory_space<smem>>, %arg4: memref<1xi32, #tpu.memory_space<smem>>, %arg5: memref<8x128xbf16, #tpu.memory_space<vmem>>, %arg6: memref<1x8x1xf32, #tpu.memory_space<vmem>>, %arg7: memref<1x1x128x256xbf16, #tpu.memory_space<vmem>>, %arg8: memref<1x128x128xbf16, #tpu.memory_space<vmem>>, %arg9: memref<8x128xbf16, #tpu.memory_space<vmem>>, %arg10: memref<8x128xf32, #tpu.memory_space<vmem>>) attributes {dimension_semantics = [#tpu.dimension_semantics<parallel>, #tpu.dimension_semantics<arbitrary>, #tpu.dimension_semantics<arbitrary>], iteration_bounds = array<i64: 1, 9, 1>, scalar_prefetch = 2 : i64, scratch_operands = 1 : i64, tpu.core_type = #tpu.core_type<tc>, window_params = [{transform_indices = @transform_0, window_bounds = array<i64: 8, 128>}, {transform_indices = @transform_1, window_bounds = array<i64: 1, 8, 1>}, {transform_indices = @transform_2, window_bounds = array<i64: 1, 1, 128, 256>}, {transform_indices = @transform_3, window_bounds = array<i64: 1, 128, 128>}, {transform_indices = @transform_4, window_bounds = array<i64: 8, 128>}]} {
    %c0_i32 = arith.constant 0 : i32
    %0 = arith.cmpi eq, %arg1, %c0_i32 : i32
    %c0_i32_0 = arith.constant 0 : i32
    %1 = arith.cmpi eq, %arg2, %c0_i32_0 : i32
    %2 = arith.andi %0, %1 : i1
    %3 = arith.extui %2 : i1 to i32
    %c0_i32_1 = arith.constant 0 : i32
    %4 = arith.cmpi ne, %3, %c0_i32_1 : i32
    scf.if %4 {
      %cst = arith.constant 0.000000e+00 : f32
      %14 = vector.broadcast %cst : f32 to vector<8x128xf32>
      %c0_5 = arith.constant 0 : index
      %c0_6 = arith.constant 0 : index
      %15 = vector.load %arg10[%c0_5, %c0_6] : memref<8x128xf32, #tpu.memory_space<vmem>>, vector<8x128xf32>
      tpu.vector_store %arg10[%c0_5, %c0_6], %14 {strides = array<i32>} : memref<8x128xf32, #tpu.memory_space<vmem>>, vector<8x128xf32>,
    } else {
    }
    %c0 = arith.constant 0 : index
    %5 = memref.load %arg4[%c0] : memref<1xi32, #tpu.memory_space<smem>>
    %6 = arith.cmpi slt, %arg1, %5 : i32
    %7 = arith.extui %6 : i1 to i32
    %c0_i32_2 = arith.constant 0 : i32
    %8 = arith.cmpi ne, %7, %c0_i32_2 : i32
    scf.if %8 {
      %c0_5 = arith.constant 0 : index
      %c0_6 = arith.constant 0 : index
      %14 = vector.load %arg5[%c0_5, %c0_6] : memref<8x128xbf16, #tpu.memory_space<vmem>>, vector<8x128xbf16>
      %c0_7 = arith.constant 0 : index
      %c0_8 = arith.constant 0 : index
      %c0_9 = arith.constant 0 : index
      %c0_10 = arith.constant 0 : index
      %15 = vector.load %arg7[%c0_7, %c0_8, %c0_9, %c0_10] : memref<1x1x128x256xbf16, #tpu.memory_space<vmem>>, vector<1x1x128x256xbf16>
      %16 = vector.shape_cast %15 : vector<1x1x128x256xbf16> to vector<128x256xbf16>
      %c0_11 = arith.constant 0 : index
      %c0_12 = arith.constant 0 : index
      %c0_13 = arith.constant 0 : index
      %17 = vector.load %arg8[%c0_11, %c0_12, %c0_13] : memref<1x128x128xbf16, #tpu.memory_space<vmem>>, vector<1x128x128xbf16>
      %18 = vector.shape_cast %17 : vector<1x128x128xbf16> to vector<128x128xbf16>
      %cst = arith.constant dense<0.000000e+00> : vector<8x256xf32>
      %19 = tpu.matmul %14, %16, %cst {dimension_numbers = #tpu.dot_dimension_numbers<[1], [0], [0], [1], [0, 0, 1, 1], [], []>} : vector<8x128xbf16>, vector<128x256xbf16>, vector<8x256xf32> -> vector<8x256xf32>
      %20 = vector.extract_strided_slice %19 {offsets = [0, 0], sizes = [8, 128], strides = [1, 1]} : vector<8x256xf32> to vector<8x128xf32>
      %21 = vector.extract_strided_slice %19 {offsets = [0, 128], sizes = [8, 128], strides = [1, 1]} : vector<8x256xf32> to vector<8x128xf32>
      %cst_14 = arith.constant 0.000000e+00 : f32
      %22 = vector.broadcast %cst_14 : f32 to vector<8x128xf32>
      %23 = arith.subf %22, %20 : vector<8x128xf32>
      %24 = math.exp %23 : vector<8x128xf32>
      %cst_15 = arith.constant 1.000000e+00 : f32
      %25 = vector.broadcast %cst_15 : f32 to vector<8x128xf32>
      %26 = arith.addf %25, %24 : vector<8x128xf32>
      %27 = tpu.reciprocal %26 {approx = true} : vector<8x128xf32> -> vector<8x128xf32>
      %28 = arith.mulf %20, %27 : vector<8x128xf32>
      %c0_16 = arith.constant 0 : index
      %c0_17 = arith.constant 0 : index
      %c0_18 = arith.constant 0 : index
      %29 = vector.load %arg6[%c0_16, %c0_17, %c0_18] : memref<1x8x1xf32, #tpu.memory_space<vmem>>, vector<1x8x1xf32>
      %30 = vector.shape_cast %29 : vector<1x8x1xf32> to vector<8x1xf32>
      %31 = arith.mulf %28, %21 : vector<8x128xf32>
      %32 = vector.broadcast %30 : vector<8x1xf32> to vector<8x128xf32>
      %33 = arith.mulf %31, %32 : vector<8x128xf32>
      %34 = arith.truncf %33 : vector<8x128xf32> to vector<8x128xbf16>
      %c0_19 = arith.constant 0 : index
      %c0_20 = arith.constant 0 : index
      %35 = vector.load %arg10[%c0_19, %c0_20] : memref<8x128xf32, #tpu.memory_space<vmem>>, vector<8x128xf32>
      %cst_21 = arith.constant dense<0.000000e+00> : vector<8x128xf32>
      %36 = tpu.matmul %34, %18, %cst_21 {dimension_numbers = #tpu.dot_dimension_numbers<[1], [0], [0], [1], [0, 0, 1, 1], [], []>} : vector<8x128xbf16>, vector<128x128xbf16>, vector<8x128xf32> -> vector<8x128xf32>
      %37 = arith.addf %35, %36 : vector<8x128xf32>
      %c0_22 = arith.constant 0 : index
      %c0_23 = arith.constant 0 : index
      %38 = vector.load %arg10[%c0_22, %c0_23] : memref<8x128xf32, #tpu.memory_space<vmem>>, vector<8x128xf32>
      tpu.vector_store %arg10[%c0_22, %c0_23], %37 {strides = array<i32>} : memref<8x128xf32, #tpu.memory_space<vmem>>, vector<8x128xf32>,
    } else {
    }
    %c8_i32 = arith.constant 8 : i32
    %9 = arith.cmpi eq, %arg1, %c8_i32 : i32
    %c0_i32_3 = arith.constant 0 : i32
    %10 = arith.cmpi eq, %arg2, %c0_i32_3 : i32
    %11 = arith.andi %9, %10 : i1
    %12 = arith.extui %11 : i1 to i32
    %c0_i32_4 = arith.constant 0 : i32
    %13 = arith.cmpi ne, %12, %c0_i32_4 : i32
    scf.if %13 {
      %c0_5 = arith.constant 0 : index
      %c0_6 = arith.constant 0 : index
      %14 = vector.load %arg10[%c0_5, %c0_6] : memref<8x128xf32, #tpu.memory_space<vmem>>, vector<8x128xf32>
      %15 = arith.truncf %14 : vector<8x128xf32> to vector<8x128xbf16>
      %c0_7 = arith.constant 0 : index
      %c0_8 = arith.constant 0 : index
      %16 = vector.load %arg9[%c0_7, %c0_8] : memref<8x128xbf16, #tpu.memory_space<vmem>>, vector<8x128xbf16>
      tpu.vector_store %arg9[%c0_7, %c0_8], %15 {strides = array<i32>} : memref<8x128xbf16, #tpu.memory_space<vmem>>, vector<8x128xbf16>,
    } else {
    }
    return
  }
  func.func @transform_0(%arg0: i32, %arg1: i32, %arg2: i32, %arg3: memref<9xi32, #tpu.memory_space<smem>>, %arg4: memref<1xi32, #tpu.memory_space<smem>>) -> (i32, i32) {
    %c0_i32 = arith.constant 0 : i32
    %c0_i32_0 = arith.constant 0 : i32
    return %arg0, %c0_i32 : i32, i32
  }
  func.func @transform_1(%arg0: i32, %arg1: i32, %arg2: i32, %arg3: memref<9xi32, #tpu.memory_space<smem>>, %arg4: memref<1xi32, #tpu.memory_space<smem>>) -> (i32, i32, i32) {
    %c0 = arith.constant 0 : index
    %0 = memref.load %arg4[%c0] : memref<1xi32, #tpu.memory_space<smem>>
    %1 = arith.cmpi slt, %arg1, %0 : i32
    %c1_i32 = arith.constant 1 : i32
    %2 = arith.subi %0, %c1_i32 : i32
    %c0_i32 = arith.constant 0 : i32
    %3 = arith.maxsi %2, %c0_i32 : i32
    %4 = arith.select %1, %arg1, %3 : i32
    %5 = arith.index_cast %4 : i32 to index
    %6 = memref.load %arg3[%5] : memref<9xi32, #tpu.memory_space<smem>>
    %c0_i32_0 = arith.constant 0 : i32
    %c0_i32_1 = arith.constant 0 : i32
    return %6, %arg0, %c0_i32_0 : i32, i32, i32
  }
  func.func @transform_2(%arg0: i32, %arg1: i32, %arg2: i32, %arg3: memref<9xi32, #tpu.memory_space<smem>>, %arg4: memref<1xi32, #tpu.memory_space<smem>>) -> (i32, i32, i32, i32) {
    %c0 = arith.constant 0 : index
    %0 = memref.load %arg4[%c0] : memref<1xi32, #tpu.memory_space<smem>>
    %1 = arith.cmpi slt, %arg1, %0 : i32
    %c1_i32 = arith.constant 1 : i32
    %2 = arith.subi %0, %c1_i32 : i32
    %c0_i32 = arith.constant 0 : i32
    %3 = arith.maxsi %2, %c0_i32 : i32
    %4 = arith.select %1, %arg1, %3 : i32
    %5 = arith.index_cast %4 : i32 to index
    %6 = memref.load %arg3[%5] : memref<9xi32, #tpu.memory_space<smem>>
    %c0_i32_0 = arith.constant 0 : i32
    %7 = arith.select %1, %arg2, %c0_i32_0 : i32
    %c0_i32_1 = arith.constant 0 : i32
    %c0_i32_2 = arith.constant 0 : i32
    %c0_i32_3 = arith.constant 0 : i32
    return %6, %7, %c0_i32_1, %c0_i32_2 : i32, i32, i32, i32
  }
  func.func @transform_3(%arg0: i32, %arg1: i32, %arg2: i32, %arg3: memref<9xi32, #tpu.memory_space<smem>>, %arg4: memref<1xi32, #tpu.memory_space<smem>>) -> (i32, i32, i32) {
    %c0 = arith.constant 0 : index
    %0 = memref.load %arg4[%c0] : memref<1xi32, #tpu.memory_space<smem>>
    %1 = arith.cmpi slt, %arg1, %0 : i32
    %c1_i32 = arith.constant 1 : i32
    %2 = arith.subi %0, %c1_i32 : i32
    %c0_i32 = arith.constant 0 : i32
    %3 = arith.maxsi %2, %c0_i32 : i32
    %4 = arith.select %1, %arg1, %3 : i32
    %5 = arith.index_cast %4 : i32 to index
    %6 = memref.load %arg3[%5] : memref<9xi32, #tpu.memory_space<smem>>
    %c0_i32_0 = arith.constant 0 : i32
    %7 = arith.select %1, %arg2, %c0_i32_0 : i32
    %c0_i32_1 = arith.constant 0 : i32
    %c0_i32_2 = arith.constant 0 : i32
    return %6, %7, %c0_i32_1 : i32, i32, i32
  }
  func.func @transform_4(%arg0: i32, %arg1: i32, %arg2: i32, %arg3: memref<9xi32, #tpu.memory_space<smem>>, %arg4: memref<1xi32, #tpu.memory_space<smem>>) -> (i32, i32) {
    %c0_i32 = arith.constant 0 : i32
    %c0_i32_0 = arith.constant 0 : i32
    return %arg0, %c0_i32 : i32, i32
  }
}

</mosaic_0001>

<bundles_post_ra>
// kernel: megrez_moe_forward.1
= control target key start
LH: loop header
LB: loop body
LE: loop exit
PB: predicated region body
PF: predicated region fallthrough
CT: control target
= control target key end

     0   :  { %s1252_s0 = inlined_call_operand.vmem [shape: s32[9], index: 0, kind: input, shape index: {}]   ;;  %s1253_s1 = inlined_call_operand.<no memory space> [shape: s32[1], index: 1, kind: input, shape index: {}]   ;;  %s1254_s2 = inlined_call_operand.vmem [shape: bf16[8,128], index: 2, kind: input, shape index: {}]   ;;  %s1255_s3 = inlined_call_operand.vmem [shape: f32[9,8,1], index: 3, kind: input, shape index: {}]   ;;  %s1256_s4 = inlined_call_operand.vmem [shape: bf16[9,1,128,256], index: 4, kind: input, shape index: {}]   ;;  %s1257_s5 = inlined_call_operand.vmem [shape: bf16[9,128,128], index: 5, kind: input, shape index: {}]   ;;  %s1258_s6 = inlined_call_operand.hbm [shape: bf16[8,128], index: 6, kind: output, shape index: {}]  }
   0x1   :  { %s11_s23 = sshll.u32 %s1252_s0, 4  ;;  %15 = sst [smem:[#allocation5]] %s1253_s1  ;;  %s12_s23 = int_to_ptr.vmem [resolvable:$true] %s11_s23 }
   0x2   :  { %s1029_s26 = scalar_lea.vmem %s12_s23, 16  ;;  %p1034_p1 = scmp.lt.s32.totalorder %s12_s23, %s12_s23 }
   0x3   :  { %p1030_p0 = scmp.ne.s32.totalorder %s12_s23, %s1029_s26  ;;  %p1035_p2 = scmp.lt.s32.totalorder %s1029_s26, %s1029_s26 }
   0x5   :  { %p1036_p3 = por %p1035_p2, %p1034_p1 }
   0x7   :  { %p1037_p4 = pnand %p1036_p3, %p1030_p0 }
   0x9   :  { %1040 = shalt.err (!%p1037_p4)  }
   0xa   :  { %s1097_s27 = smov [#allocation4]  }
   0xb   :  { %14 = dma.vmem_to_smem %s12_s23, 16, %s1097_s27, [#allocation3] }
   0xc   :  { %1079 = dma.done.wait [#allocation3], 16 }
   0xd   :  { %1080 = vsyncadd [#allocation3], 4294967280 }
   0xe   :  { %17 = sfence }
   0xf   :  { %18 = vsyncpa [#allocation7], 0  ;;  %s1144_s28 = smov 0   ;;  %s1146_s0 = smov 0  }
  0x10   :  { %s1148_s29 = smov 0  }
  0x11 LB: > { %s873_s1 = sadd.s32 4294967295, %s1095_s29   ;;  %s39_s30 = sadd.s32 1, %s1091_s0  ;;  %s1095_s29 = sphi %s1148_s29, %s24_s29   ;;  %s1091_s0 = sphi %s1146_s0, %s1261_s0   ;;  %s1087_s28 = sphi %s1144_s28, %s1260_s28  }
  0x12   : > { %p41_p5 = scmp.ge.s32.totalorder %s39_s30, 9  ;;  %p883_p6 = scmp.ge.s32.totalorder %s1095_s29, 1 }
  0x13   : > { %p329_p7 = scmp.lt.s32.totalorder %s1095_s29, 10 }
  0x14   : > { %s1263_s30 = smov (%p41_p5, %s39_s30), 0 }
  0x15   : > { %p330_p8 = pnand %p883_p6, %p329_p7 }
  0x16   : > { %s401_s7 = sld [smem:[#allocation5]] (!%p330_p8)  ;;  %p474_p9 = scmp.eq.s32.totalorder (!%p330_p8), %s1087_s28, 0 }
  0x17   : > { %333 = sbr.rel (%p330_p8) target bundleno = 587 (0x24b), region = 36 }
  0x1c   : > { %s884_s8 = sadd.s32 (!%p330_p8), 4294967295, %s401_s7  ;;  %p402_p10 = scmp.lt.s32.totalorder (!%p330_p8), %s1087_s28, %s401_s7 }
  0x1d   : > { %p404_p11 = scmp.gt.s32.totalorder (!%p330_p8), %s884_s8, 0 }
  0x1e   : > { %v1098_v0 = vmov (%p474_p9), 0.0  }
  0x1f   : > { %s1265_s8 = smov (!%p404_p11, %s884_s8), 0  ;;  %480 = vst [vmem:[#allocation2] sm:$0xff] (%p474_p9), %v1098_v0 }
  0x20   : > { %s406_s9 = scalar_select %p402_p10, %s1087_s28, %s1265_s8 }
  0x22   : > { %s407_s10 = sld [smem:[#allocation4 + %s406_s9]] }
  0x23   : > { %s428_s11 = sld [smem:[#allocation4 + %s406_s9]] }
  0x24   : > { %s453_s12 = sld [smem:[#allocation4 + %s406_s9]] }
  0x28   : > { %p408_p12 = scmp.lt.s32.totalorder %s407_s10, 8 }
  0x29   : > { %p430_p13 = scmp.lt.s32.totalorder %s428_s11, 8  ;;  %479 = sbr.rel (!%p474_p9) target bundleno = 48 (0x30), region = 40 }
  0x2a   : > { %p456_p0 = scmp.lt.s32.totalorder %s453_s12, 8  ;;  %s1267_s10 = smov (!%p408_p12, %s407_s10), 8 }
  0x2b   : > { %s1269_s11 = smov (!%p430_p13, %s428_s11), 8  ;;  %s885_s13 = sshll.u32 %s1267_s10, 3 }
  0x2c   : > { %s1171_s16 = scalar_lea.vmem %s1255_s3, %s885_s13  ;;  %s923_s17 = sshll.u32 %s1269_s11, 7 }
  0x2d   : > { %s1176_s20 = scalar_lea.vmem %s1256_s4, %s923_s17  ;;  %s1271_s12 = smov (!%p456_p0, %s453_s12), 8 }
  0x2e   : > { %s924_s21 = sshll.u32 %s1271_s12, 6 }
  0x2f   : > { %s1181_s24 = scalar_lea.vmem %s1257_s5, %s924_s21 }
  0x30 PF: > { %s481_s25 = sld [smem:[#allocation5]] }
  0x36   : > { %p893_p1 = scmp.ge.s32.totalorder %s1087_s28, %s481_s25 }
  0x37   : > { %v993_v1 = vld [vmem:[%s1176_s20 + $0x4] ss:$8 sps:$4 sm:$0xff] (!%p893_p1)   ;;  %v995_v2 = vld [vmem:[%s1176_s20] ss:$8 sps:$4 sm:$0xff] (!%p893_p1)   ;;  %v1099_v3 = vmov (!%p893_p1), 0   ;;  %v1100_v21 = vmov (!%p893_p1), 0.0  }
  0x38   : > { %485 = sbr.rel (%p893_p1) target bundleno = 552 (0x228), region = 44  ;;  %631 = vmatprep.mubr.bf16.mxu0 (!%p893_p1), %v1099_v3  ;;  %992 = vset.pattern.permute.xlu0 (!%p893_p1), %v1099_v3  ;;  %v996_v4 = vld [vmem:[%s1176_s20 + $0x14] ss:$8 sps:$4 sm:$0xff] (!%p893_p1)   ;;  %v998_v5 = vld [vmem:[%s1176_s20 + $0x10] ss:$8 sps:$4 sm:$0xff] (!%p893_p1)   ;;  %v646_v11 = vld [vmem:[%s1171_s16] sm:$0xff] (!%p893_p1) }
  0x39   : > { %599 = vmatprep.subr.bf16.mxu0 (!%p893_p1), %v993_v1  ;;  %v999_v6 = vld [vmem:[%s1176_s20 + $0x24] ss:$8 sps:$4 sm:$0xff] (!%p893_p1)   ;;  %v1001_v7 = vld [vmem:[%s1176_s20 + $0x20] ss:$8 sps:$4 sm:$0xff] (!%p893_p1)   ;;  %v1002_v8 = vld [vmem:[%s1176_s20 + $0x34] ss:$8 sps:$4 sm:$0xff] (!%p893_p1)   ;;  %650 = vperm.xlu0 (!%p893_p1), %992, %v646_v11  }
  0x3a   : > { %600 = vmatpush1.bf16.msra.mxu0 (!%p893_p1), %v995_v2  ;;  %v1004_v9 = vld [vmem:[%s1176_s20 + $0x30] ss:$8 sps:$4 sm:$0xff] (!%p893_p1)   ;;  %v1005_v10 = vld [vmem:[%s1176_s20 + $0x44] ss:$8 sps:$4 sm:$0xff] (!%p893_p1)   ;;  %v1007_v12 = vld [vmem:[%s1176_s20 + $0x40] ss:$8 sps:$4 sm:$0xff] (!%p893_p1)   ;;  %936 = vmatprep.subr.bf16.mxu1 (!%p893_p1), %v1100_v21 }
  0x3b   : > { %601 = vmatprep.subr.bf16.mxu0 (!%p893_p1), %v996_v4  ;;  %v1008_v13 = vld [vmem:[%s1176_s20 + $0x54] ss:$8 sps:$4 sm:$0xff] (!%p893_p1)   ;;  %v1010_v14 = vld [vmem:[%s1176_s20 + $0x50] ss:$8 sps:$4 sm:$0xff] (!%p893_p1)   ;;  %v1011_v15 = vld [vmem:[%s1176_s20 + $0x64] ss:$8 sps:$4 sm:$0xff] (!%p893_p1)  }
  0x3c   : > { %v1013_v16 = vld [vmem:[%s1176_s20 + $0x60] ss:$8 sps:$4 sm:$0xff] (!%p893_p1)   ;;  %v1014_v17 = vld [vmem:[%s1176_s20 + $0x74] ss:$8 sps:$4 sm:$0xff] (!%p893_p1)   ;;  %v1016_v18 = vld [vmem:[%s1176_s20 + $0x70] ss:$8 sps:$4 sm:$0xff] (!%p893_p1)  }
  0x3d   : > { %v486_v19 = vld [vmem:[%s1254_s2] sm:$0xf] (!%p893_p1)  ;;  %v1018_v22 = vld [vmem:[%s1181_s24 + $0x8] sm:$0xff] (!%p893_p1)   ;;  %v1019_v23 = vld [vmem:[%s1181_s24 + $0x10] sm:$0xff] (!%p893_p1)   ;;  %vm1101_vm0 = vmmov (!%p893_p1), 0  }
  0x3e   : > { %602 = vmatpush1.bf16.msra.mxu0 (!%p893_p1), %v998_v5  ;;  %v1017_v20 = vld [vmem:[%s1181_s24] sm:$0xff] (!%p893_p1)   ;;  %v1020_v24 = vld [vmem:[%s1181_s24 + $0x18] sm:$0xff] (!%p893_p1)   ;;  %v1022_v26 = vld [vmem:[%s1181_s24 + $0x28] sm:$0xff] (!%p893_p1)   ;;  %952 = vmatprep.mubr.msk.bf16.mxu1 (!%p893_p1), %vm1101_vm0, %v1100_v21 }
  0x3f   : > { %603 = vmatprep.subr.bf16.mxu0 %v999_v6  ;;  %937 = vmatpush3.bf16.msra.mxu1 %v1017_v20  ;;  %v1021_v25 = vld [vmem:[%s1181_s24 + $0x20] sm:$0xff]   ;;  %v1023_v27 = vld [vmem:[%s1181_s24 + $0x30] sm:$0xff]   ;;  %v1024_v28 = vld [vmem:[%s1181_s24 + $0x38] sm:$0xff]  }
  0x40   : > { %938 = vmatprep.subr.bf16.mxu1 %v1100_v21  ;;  %v655_v43 = vld [vmem:[#allocation2] sm:$0xff] }
  0x42   : > { %604 = vmatpush1.bf16.msra.mxu0 %v1001_v7 }
  0x43   : > { %605 = vmatprep.subr.bf16.mxu0 %v1002_v8  ;;  %939 = vmatpush3.bf16.msra.mxu1 %v1018_v22 }
  0x44   : > { %940 = vmatprep.subr.bf16.mxu1 %v1100_v21 }
  0x46   : > { %606 = vmatpush1.bf16.msra.mxu0 %v1004_v9 }
  0x47   : > { %607 = vmatprep.subr.bf16.mxu0 %v1005_v10  ;;  %941 = vmatpush3.bf16.msra.mxu1 %v1019_v23 }
  0x48   : > { %942 = vmatprep.subr.bf16.mxu1 %v1100_v21 }
  0x4a   : > { %608 = vmatpush1.bf16.msra.mxu0 %v1007_v12 }
  0x4b   : > { %609 = vmatprep.subr.bf16.mxu0 %v1008_v13  ;;  %943 = vmatpush3.bf16.msra.mxu1 %v1020_v24 }
  0x4c   : > { %944 = vmatprep.subr.bf16.mxu1 %v1100_v21 }
  0x4e   : > { %610 = vmatpush1.bf16.msra.mxu0 %v1010_v14 }
  0x4f   : > { %611 = vmatprep.subr.bf16.mxu0 %v1011_v15  ;;  %945 = vmatpush3.bf16.msra.mxu1 %v1021_v25 }
  0x50   : > { %946 = vmatprep.subr.bf16.mxu1 %v1100_v21 }
  0x52   : > { %612 = vmatpush1.bf16.msra.mxu0 %v1013_v16 }
  0x53   : > { %613 = vmatprep.subr.bf16.mxu0 %v1014_v17  ;;  %947 = vmatpush3.bf16.msra.mxu1 %v1022_v26 }
  0x54   : > { %948 = vmatprep.subr.bf16.mxu1 %v1100_v21 }
  0x56   : > { %614 = vmatpush1.bf16.msra.mxu0 %v1016_v18 }
  0x57   : > { %949 = vmatpush3.bf16.msra.mxu1 %v1023_v27 }
  0x58   : > { %950 = vmatprep.subr.bf16.mxu1 %v1100_v21 }
  0x59   : > { %632 = vmatmul.mubr.bf16.vlgmr.msra.gmra.mrb[0].mxu0 %v486_v19 }
  0x5b   : > { %951 = vmatpush3.bf16.msra.mxu1 %v1024_v28 }
  0xb8   : > { %v651_v39 = vpop.permute.xlu0 %650 }
 0x12c   : > { %v633_v29 = vpop.f32.mrb[0].mxu0 }
 0x12d   : > { %v640_v30 = vsub.f32 0.0, %v633_v29  ;;  %v635_v31 = vpop.f32.mrb[1].mxu0 }
 0x12e   : > { %v637_v32 = vpop.f32.mrb[2].mxu0 }
 0x12f   : > { %v641_v33 = vmul.f32 1.442695, %v640_v30  ;;  %v638_v34 = vpop.f32.mrb[3].mxu0 }
 0x131   : > { %1025 = vpow2.f32 %v641_v33 }
 0x13b   : > { %v1026_v35 = vpop.eup %1025 }
 0x13c   : > { %v643_v36 = vadd.f32 1.0, %v1026_v35 }
 0x13e   : > { %1027 = vrcp.f32 %v643_v36 }
 0x148   : > { %v1028_v37 = vpop.eup %1027 }
 0x149   : > { %v645_v38 = vmul.f32 %v1028_v37, %v633_v29 }
 0x14b   : > { %v647_v40 = vmul.f32 %v645_v38, %v635_v31 }
 0x14d   : > { %v653_v41 = vmul.f32 %v651_v39, %v647_v40 }
 0x14f   : > { %v654_v42 = vpack.c.bf16 %v653_v41, %v653_v41 }
 0x151   : > { %953 = vmatmul.mubr.bf16.vlgmr.msra.gmra.mrb[0].mxu1 %v654_v42 }
 0x224   : > { %v738_v44 = vpop.f32.mrb[0].mxu1 }
 0x225   : > { %v744_v45 = vadd.f32 %v738_v44, %v655_v43  ;;  %v954_v46 = vpop.f32.mrb[1].mxu1 }
 0x226   : > { %v741_v47 = vpop.f32.mrb[2].mxu1 }
 0x227   : > { %745 = vst [vmem:[#allocation2] sm:$0xff] %v744_v45  ;;  %v955_v48 = vpop.f32.mrb[3].mxu1 }
 0x228 PF: > { %p746_p2 = scmp.eq.s32.totalorder %s1087_s28, 8 }
 0x22a   : > { %750 = sbr.rel (!%p746_p2) target bundleno = 562 (0x232), region = 48 }
 0x22e   : > { %v751_v49 = vld [vmem:[#allocation2] sm:$0xff] (%p746_p2) }
 0x22f   : > { %v752_v50 = vpack.c.bf16 (%p746_p2), %v751_v49, %v751_v49 }
 0x231   : > { %753 = vst [vmem:[#allocation6] sm:$0xf] %v752_v50 }
 0x232 PF: > { %p1217_p3 = scmp.eq.s32.totalorder %s873_s1, 8  ;;  %s1102_s8 = smov [#allocation6]  }
 0x233   : > { %s763_s9 = sshll.u32 %s1102_s8, 4  ;;  %s764_s9 = int_to_ptr.vmem [resolvable:$true] %s763_s9 }
 0x234   : > { %s1041_s10 = scalar_lea.vmem %s764_s9, 64  ;;  %p1048_p7 = scmp.lt.s32.totalorder %s764_s9, %s764_s9 }
 0x235   : > { %p1042_p4 = scmp.ne.s32.totalorder %s764_s9, %s1041_s10  ;;  %p1049_p8 = scmp.lt.s32.totalorder %s1041_s10, %s1041_s10 }
 0x237   : > { %p1043_p5 = pnand %p1042_p4, %p1217_p3  ;;  %p1050_p9 = por %p1049_p8, %p1048_p7 }
 0x239   : > { %p1044_p6 = pneg %p1043_p5 }
 0x23b   : > { %p1051_p10 = pnand %p1050_p9, %p1044_p6 }
 0x23d   : > { %1054 = shalt.err (!%p1051_p10)
}
 0x23e   : > { %s1055_s1 = scalar_lea.hbm %s1258_s6, 64 }
 0x23f   : > { %p1056_p11 = scmp.ne.s32.totalorder %s1258_s6, %s1055_s1  ;;  %p1061_p0 = scmp.lt.u32.totalorder %s1055_s1, %s1258_s6 }
 0x241   : > { %p1057_p12 = pnand %p1056_p11, %p1217_p3 }
 0x243   : > { %p1058_p13 = pneg %p1057_p12 }
 0x245   : > { %p1063_p1 = pnand %p1061_p0, %p1058_p13 }
 0x247   : > { %1066 = shalt.err (!%p1063_p1)
}
 0x248   : > { %957 = dma.vmem_to_hbm [thread:$0]  (%p1217_p3), %s764_s9, 64, %s1258_s6, [#allocation7]  }
 0x249   : > { %1082 = dma.done.wait (%p1217_p3), [#allocation7], 64  }
 0x24a   : > { %1084 = vsyncadd (%p1217_p3), [#allocation7], 4294967232 }
 0x24b PF: > { %s24_s29 = sadd.s32 1, %s1095_s29   ;;  %s1260_s28 = smov %s1091_s0 }
 0x24c   : > { %p21_p2 = scmp.ge.s32.totalorder %s24_s29, 11   ;;  %s1261_s0 = smov %s1263_s30 }
 0x24e   :  { %23 = sbr.rel (!%p21_p2) target bundleno = 17 (0x11), region = 85 }
 0x255   :  { %776 = vsyncpa [#allocation7], 1 }
 0x256   :  { %778 = vsyncpa [#allocation7 + $0x1], 1 }

</bundles_post_ra>
